<compile_context>
chip_gen: v7x
topology: tpu7x:2x2x1
jax: 0.10.0
libtpu: 0.0.40
codegen_flags: <defaults>
</compile_context>

<pallas_src>
import functools

import jax
import jax.numpy as jnp
from jax.experimental import pallas as pl
from jax.experimental.pallas import tpu as pltpu


def _round_up(x, m):
    return (x + m - 1) // m * m


def _interact_kernel(q_ref, a_ref, w_ref, o_ref, *, n_q, n_a):
    # q_ref: [TB, n_q], a_ref: [TB, n_a], w_ref: [n_q*n_a, TD], o_ref: [TB, TD]
    q = q_ref[...]
    a = a_ref[...]
    tb = q.shape[0]
    # VPU outer product, flattened so the (i, j) contraction becomes the MXU
    # K dimension of a single matmul.
    qa = (q[:, :, None] * a[:, None, :]).reshape(tb, n_q * n_a)
    o_ref[...] = jnp.dot(
        qa, w_ref[...], preferred_element_type=jnp.float32
    ).astype(o_ref.dtype)


def interact_layer(q_input, a_input, W, *, block_b=128, block_d=512,
                   compute_dtype=None):
    """out[b, d] = sum_{i,j} q[b,i] * W[i,d,j] * a[b,j].

    q_input: [B, n_q], a_input: [B, n_a], W: [n_q, dim, n_a] -> out: [B, dim].
    compute_dtype: e.g. jnp.bfloat16 to run the MXU in bf16 (f32 accumulate).
    """
    B, n_q = q_input.shape
    n_q_w, dim, n_a = W.shape
    assert n_q == n_q_w
    assert a_input.shape == (B, n_a)
    # The PyTorch module's .view(-1, dim, n_q) is only well-defined for n_q == n_a.
    assert n_q == n_a, "InteractLayer semantics require n_q == n_a"
    assert block_b % 8 == 0 and block_d % 128 == 0

    out_dtype = q_input.dtype
    if compute_dtype is not None:
        q_input = q_input.astype(compute_dtype)
        a_input = a_input.astype(compute_dtype)
        W = W.astype(compute_dtype)

    # One-time glue (would be pre-folded into the parameter in a real model):
    # W2[i*n_a + j, d] = W[i, d, j]
    K = n_q * n_a
    W2 = jnp.transpose(W, (0, 2, 1)).reshape(K, dim)

    # Lane-dense output: tile/pad dim to a multiple of 128.
    tile_d = min(block_d, _round_up(dim, 128))
    dim_p = _round_up(dim, tile_d)
    if dim_p != dim:
        W2 = jnp.pad(W2, ((0, 0), (0, dim_p - dim)))

    # Sublane-aligned batch tiles.
    tile_b = min(block_b, _round_up(B, 8))
    B_p = _round_up(B, tile_b)
    if B_p != B:
        q_input = jnp.pad(q_input, ((0, B_p - B), (0, 0)))
        a_input = jnp.pad(a_input, ((0, B_p - B), (0, 0)))

    n_d, n_b = dim_p // tile_d, B_p // tile_b
    in_bytes = jnp.dtype(q_input.dtype).itemsize
    cost = pl.CostEstimate(
        flops=2 * B_p * K * dim_p + B_p * K,
        transcendentals=0,
        bytes_accessed=(q_input.size + a_input.size + W2.size) * in_bytes
        + B_p * dim_p * jnp.dtype(out_dtype).itemsize,
    )

    kernel = functools.partial(_interact_kernel, n_q=n_q, n_a=n_a)
    out = pl.pallas_call(
        kernel,
        out_shape=jax.ShapeDtypeStruct((B_p, dim_p), out_dtype),
        grid=(n_d, n_b),  # dim tiles outer, batch inner -> W2 tile stays resident
        in_specs=[
            pl.BlockSpec((tile_b, n_q), lambda d, b: (b, 0)),
            pl.BlockSpec((tile_b, n_a), lambda d, b: (b, 0)),
            pl.BlockSpec((K, tile_d), lambda d, b: (0, d)),
        ],
        out_specs=pl.BlockSpec((tile_b, tile_d), lambda d, b: (b, d)),
        compiler_params=pltpu.CompilerParams(
            dimension_semantics=("parallel", "parallel"),
        ),
        cost_estimate=cost,
    )(q_input, a_input, W2)

    return out[:B, :dim]


def interact_layer_ref(q_input, a_input, W):
    # Exact PyTorch forward (its .view only works for n_q == n_a, in which case
    # it equals this einsum): out[b,d] = sum_{i,j} q[b,i] W[i,d,j] a[b,j].
    return jnp.einsum("bi,idj,bj->bd", q_input, W, a_input,
                      precision=jax.lax.Precision.HIGHEST)


def _check(out, ref, name):
    err = float(jnp.max(jnp.abs(out - ref)))
    scale = float(jnp.max(jnp.abs(ref))) + 1.0
    assert err < 2e-2 * scale, f"{name}: mismatch vs reference (err={err})"


if __name__ == "__main__":
    key = jax.random.PRNGKey(0)
    k_w, k_q, k_a, k_w2, k_q2, k_a2 = jax.random.split(key, 6)

    # Small shapes consistent with the module (n_q == n_a required by its view).
    B, n_q, n_a, dim = 2, 8, 8, 32
    W = jax.random.normal(k_w, (n_q, dim, n_a), dtype=jnp.float32) * 0.05
    q = jax.random.normal(k_q, (B, n_q), dtype=jnp.float32)
    a = jax.random.normal(k_a, (B, n_a), dtype=jnp.float32)

    out = jax.block_until_ready(interact_layer(q, a, W))
    ref = interact_layer_ref(q, a, W)
    assert out.shape == (B, dim)
    _check(out, ref, "small")

    # Second check: exercises the multi-tile grid (3 batch tiles x 2 dim tiles)
    # and the batch/dim padding paths.
    B2, nq2, na2, dim2 = 20, 16, 16, 200
    W_2 = jax.random.normal(k_w2, (nq2, dim2, na2), dtype=jnp.float32) * 0.05
    q_2 = jax.random.normal(k_q2, (B2, nq2), dtype=jnp.float32)
    a_2 = jax.random.normal(k_a2, (B2, na2), dtype=jnp.float32)
    out2 = jax.block_until_ready(
        interact_layer(q_2, a_2, W_2, block_b=8, block_d=128))
    ref2 = interact_layer_ref(q_2, a_2, W_2)
    assert out2.shape == (B2, dim2)
    _check(out2, ref2, "tiled")

    print("KERNEL_OK")
</pallas_src>

<mosaic_0001>
module attributes {stable_mosaic.version = 11 : i64} {
  func.func @_interact_kernel(%arg0: i32, %arg1: i32, %arg2: memref<8x8xf32, #tpu.memory_space<vmem>>, %arg3: memref<8x8xf32, #tpu.memory_space<vmem>>, %arg4: memref<64x128xf32, #tpu.memory_space<vmem>>, %arg5: memref<8x128xf32, #tpu.memory_space<vmem>>) attributes {dimension_semantics = [#tpu.dimension_semantics<parallel>, #tpu.dimension_semantics<parallel>], iteration_bounds = array<i64: 1, 1>, scalar_prefetch = 0 : i64, scratch_operands = 0 : i64, tpu.core_type = #tpu.core_type<tc>, window_params = [{transform_indices = @transform_0, window_bounds = array<i64: 8, 8>}, {transform_indices = @transform_1, window_bounds = array<i64: 8, 8>}, {transform_indices = @transform_2, window_bounds = array<i64: 64, 128>}, {transform_indices = @transform_3, window_bounds = array<i64: 8, 128>}]} {
    %c0 = arith.constant 0 : index
    %c0_0 = arith.constant 0 : index
    %0 = vector.load %arg2[%c0, %c0_0] : memref<8x8xf32, #tpu.memory_space<vmem>>, vector<8x8xf32>
    %c0_1 = arith.constant 0 : index
    %c0_2 = arith.constant 0 : index
    %1 = vector.load %arg3[%c0_1, %c0_2] : memref<8x8xf32, #tpu.memory_space<vmem>>, vector<8x8xf32>
    %2 = vector.shape_cast %0 : vector<8x8xf32> to vector<8x8x1xf32>
    %3 = vector.shape_cast %1 : vector<8x8xf32> to vector<8x1x8xf32>
    %4 = vector.broadcast %2 : vector<8x8x1xf32> to vector<8x8x8xf32>
    %5 = vector.broadcast %3 : vector<8x1x8xf32> to vector<8x8x8xf32>
    %6 = arith.mulf %4, %5 : vector<8x8x8xf32>
    %7 = vector.shape_cast %6 : vector<8x8x8xf32> to vector<8x64xf32>
    %c0_3 = arith.constant 0 : index
    %c0_4 = arith.constant 0 : index
    %8 = vector.load %arg4[%c0_3, %c0_4] : memref<64x128xf32, #tpu.memory_space<vmem>>, vector<64x128xf32>
    %cst = arith.constant dense<0.000000e+00> : vector<8x128xf32>
    %9 = tpu.matmul %7, %8, %cst {dimension_numbers = #tpu.dot_dimension_numbers<[1], [0], [0], [1], [0, 0, 1, 1], [], []>} : vector<8x64xf32>, vector<64x128xf32>, vector<8x128xf32> -> vector<8x128xf32>
    %c0_5 = arith.constant 0 : index
    %c0_6 = arith.constant 0 : index
    %10 = vector.load %arg5[%c0_5, %c0_6] : memref<8x128xf32, #tpu.memory_space<vmem>>, vector<8x128xf32>
    tpu.vector_store %arg5[%c0_5, %c0_6], %9 {strides = array<i32>} : memref<8x128xf32, #tpu.memory_space<vmem>>, vector<8x128xf32>,
    return
  }
  func.func @transform_0(%arg0: i32, %arg1: i32) -> (i32, i32) {
    %c0_i32 = arith.constant 0 : i32
    %c0_i32_0 = arith.constant 0 : i32
    return %arg1, %c0_i32 : i32, i32
  }
  func.func @transform_1(%arg0: i32, %arg1: i32) -> (i32, i32) {
    %c0_i32 = arith.constant 0 : i32
    %c0_i32_0 = arith.constant 0 : i32
    return %arg1, %c0_i32 : i32, i32
  }
  func.func @transform_2(%arg0: i32, %arg1: i32) -> (i32, i32) {
    %c0_i32 = arith.constant 0 : i32
    %c0_i32_0 = arith.constant 0 : i32
    return %c0_i32, %arg0 : i32, i32
  }
  func.func @transform_3(%arg0: i32, %arg1: i32) -> (i32, i32) {
    %c0_i32 = arith.constant 0 : i32
    return %arg1, %arg0 : i32, i32
  }
}

</mosaic_0001>

<bundles_post_ra>
// kernel: tpu_custom_call.1
= control target key start
LH: loop header
LB: loop body
LE: loop exit
PB: predicated region body
PF: predicated region fallthrough
CT: control target
= control target key end

     0   :  { %8 = vsyncpa [#allocation3], 0  ;;  %s755_s0 = inlined_call_operand.hbm [shape: f32[8,8], index: 0, kind: input, shape index: {}]   ;;  %s756_s1 = inlined_call_operand.hbm [shape: f32[8,8], index: 1, kind: input, shape index: {}]   ;;  %s757_s2 = inlined_call_operand.hbm [shape: f32[64,128], index: 2, kind: input, shape index: {}]   ;;  %s758_s3 = inlined_call_operand.hbm [shape: f32[8,128], index: 3, kind: output, shape index: {}]  }
   0x1   :  { %9 = vsyncpa [#allocation6], 0 }
   0x2   :  { %10 = vsyncpa [#allocation4], 0  ;;  %s639_s12 = smov [#allocation5]   ;;  %s640_s14 = smov [#allocation2]  }
   0x3   :  { %s27_s13 = sshll.u32 %s639_s12, 4  ;;  %s17_s15 = sshll.u32 %s640_s14, 4  ;;  %s28_s13 = int_to_ptr.vmem [resolvable:$true] %s27_s13  ;;  %s18_s15 = int_to_ptr.vmem [resolvable:$true] %s17_s15 }
   0x4   :  { %s545_s18 = scalar_lea.hbm %s756_s1, 128 }
   0x5   :  { %p546_p0 = scmp.ne.s32.totalorder %s756_s1, %s545_s18  ;;  %p549_p1 = scmp.lt.u32.totalorder %s545_s18, %s756_s1 }
   0x7   :  { %p551_p2 = pnand %p549_p1, %p546_p0 }
   0x9   :  { %554 = shalt.err (!%p551_p2)
}
   0xa   :  { %s555_s23 = scalar_lea.vmem %s28_s13, 128  ;;  %p560_p4 = scmp.lt.s32.totalorder %s28_s13, %s28_s13 }
   0xb   :  { %p556_p3 = scmp.ne.s32.totalorder %s28_s13, %s555_s23  ;;  %p561_p5 = scmp.lt.s32.totalorder %s555_s23, %s555_s23 }
   0xd   :  { %p562_p6 = por %p561_p5, %p560_p4 }
   0xf   :  { %p563_p7 = pnand %p562_p6, %p556_p3 }
  0x11   :  { %566 = shalt.err (!%p563_p7)
}
  0x12   :  { %30 = dma.hbm_to_vmem [thread:$0]  %s756_s1, 128, %s28_s13, [#allocation6]  }
  0x13   :  { %s567_s28 = scalar_lea.hbm %s755_s0, 128 }
  0x14   :  { %p568_p8 = scmp.ne.s32.totalorder %s755_s0, %s567_s28  ;;  %p571_p9 = scmp.lt.u32.totalorder %s567_s28, %s755_s0 }
  0x16   :  { %p573_p10 = pnand %p571_p9, %p568_p8 }
  0x18   :  { %576 = shalt.err (!%p573_p10)
}
  0x19   :  { %s577_s6 = scalar_lea.vmem %s18_s15, 128  ;;  %p582_p12 = scmp.lt.s32.totalorder %s18_s15, %s18_s15 }
  0x1a   :  { %p578_p11 = scmp.ne.s32.totalorder %s18_s15, %s577_s6  ;;  %p583_p13 = scmp.lt.s32.totalorder %s577_s6, %s577_s6 }
  0x1c   :  { %p584_p0 = por %p583_p13, %p582_p12 }
  0x1e   :  { %p585_p1 = pnand %p584_p0, %p578_p11 }
  0x20   :  { %588 = shalt.err (!%p585_p1)
}
  0x21   :  { %20 = dma.hbm_to_vmem [thread:$0]  %s755_s0, 128, %s18_s15, [#allocation3]  }
  0x22   :  { %s641_s8 = smov [#allocation7]   ;;  %s589_s12 = scalar_lea.hbm %s757_s2, 1024 }
  0x23   :  { %s36_s9 = sshll.u32 %s641_s8, 4  ;;  %p590_p2 = scmp.ne.s32.totalorder %s757_s2, %s589_s12  ;;  %s37_s9 = int_to_ptr.vmem [resolvable:$true] %s36_s9 }
  0x24   :  { %p593_p3 = scmp.lt.u32.totalorder %s589_s12, %s757_s2 }
  0x26   :  { %p595_p4 = pnand %p593_p3, %p590_p2 }
  0x28   :  { %598 = shalt.err (!%p595_p4)
}
  0x29   :  { %s599_s18 = scalar_lea.vmem %s37_s9, 1024  ;;  %p604_p6 = scmp.lt.s32.totalorder %s37_s9, %s37_s9 }
  0x2a   :  { %p600_p5 = scmp.ne.s32.totalorder %s37_s9, %s599_s18  ;;  %p605_p7 = scmp.lt.s32.totalorder %s599_s18, %s599_s18 }
  0x2c   :  { %p606_p8 = por %p605_p7, %p604_p6 }
  0x2e   :  { %p607_p9 = pnand %p606_p8, %p600_p5 }
  0x30   :  { %610 = shalt.err (!%p607_p9)
}
  0x31   :  { %s642_s0 = smov 128   ;;  %s643_s15 = smov 8  }
  0x32   :  { %42 = dma.hbm_to_vmem [thread:$0]  %s757_s2, 1024, %s37_s9, [#allocation6], %s642_s0, %s642_s0, %s643_s15  }
  0x33   :  { %633 = dma.done.wait [#allocation3], 128  }
  0x34   :  { %634 = vsyncadd [#allocation3], 4294967168 }
  0x35   :  { %635 = dma.done.wait [#allocation6], 1152  }
  0x36   :  { %636 = vsyncadd [#allocation6], 4294966144  ;;  %v54_v0 = vlaneseq  ;;  %v644_v1 = vmov 1966171168   ;;  %v52_v10 = vld [vmem:[#allocation2] sm:$0xff]  ;;  %v53_v11 = vld [vmem:[#allocation5] sm:$0xff] }
  0x37   :  { %v113_v2 = vunpack.c.l.s4 %v644_v1  ;;  %v111_v19 = vcombine.high %v53_v11, %v53_v11  ;;  %v386_v45 = vld [vmem:[#allocation7] sm:$0xff]  ;;  %v387_v46 = vld [vmem:[#allocation7 + $0x8] sm:$0xff]  ;;  %v645_v47 = vmov 0.0|0.0   ;;  %v646_v49 = vmov 1983009808   ;;  %s648_s2 = smov 16  }
  0x38   :  { %v714_v3 = vshrl.u32 %v54_v0, 7  ;;  %514 = vmatprep.subr.bf16.mxu0 %v645_v47  ;;  %v515_v48 = vpack.c.bf16 %v387_v46, %v386_v45  ;;  %v211_v50 = vunpack.c.l.s4 %v646_v49  ;;  %v647_v54 = vmov 1934713408   ;;  %s651_s21 = smov 32   ;;  %s652_s22 = smov 24  }
  0x39   :  { %v114_v4 = vunpack.c.0.s8 %v113_v2  ;;  %v275_v55 = vunpack.c.l.s4 %v647_v54  ;;  %vm649_vm0 = vmmov 0   ;;  %s653_s23 = smov 48   ;;  %s654_s24 = smov 40   ;;  %vm372_vm1 = vcmask 64512  }
  0x3a   :  { %v70_v5 = vsub.s32 2, %v714_v3  ;;  %v718_v6 = vsub.s32 0, %v714_v3  ;;  %v77_v7 = vsub.s32 3, %v714_v3  ;;  %v63_v8 = vsub.s32 1, %v714_v3  ;;  %516 = vmatpush3.bf16.msra.mxu0 %v515_v48  ;;  %s655_s25 = smov 56   ;;  %s656_s26 = smov [#allocation8]  }
  0x3b   :  { %v117_v9 = vsub.s32 %v114_v4, %v714_v3  ;;  %v91_v15 = vsub.s32 5, %v714_v3  ;;  %v84_v16 = vsub.s32 4, %v714_v3  ;;  %v105_v25 = vsub.s32 7, %v714_v3  ;;  %517 = vmatprep.subr.bf16.mxu0 %v645_v47  ;;  %s475_s27 = sshll.u32 %s656_s26, 4  ;;  %s476_s27 = int_to_ptr.vmem [resolvable:$true] %s475_s27 }
  0x3c   :  { %v71_v12 = vrot.slane %v52_v10, %v70_v5  ;;  %v57_v13 = vrot.slane %v52_v10, %v718_v6  ;;  %v78_v14 = vrot.slane %v52_v10, %v77_v7  ;;  %v64_v17 = vrot.slane %v52_v10, %v63_v8  ;;  %s611_s28 = scalar_lea.vmem %s476_s27, 128  ;;  %p616_p11 = scmp.lt.s32.totalorder %s476_s27, %s476_s27 }
  0x3d   :  { %v118_v18 = vrot.slane %v53_v11, %v117_v9  ;;  %v125_v22 = vrot.slane %v111_v19, %v117_v9  ;;  %v92_v23 = vrot.slane %v52_v10, %v91_v15  ;;  %v85_v24 = vrot.slane %v52_v10, %v84_v16  ;;  %p612_p10 = scmp.ne.s32.totalorder %s476_s27, %s611_s28  ;;  %p617_p12 = scmp.lt.s32.totalorder %s611_s28, %s611_s28 }
  0x3e   :  { %73 = vbcast.lane.b32.xlu1 %v71_v12, 256  ;;  %59 = vbcast.lane.b32.xlu0 %v57_v13, 256  ;;  %v98_v26 = vsub.s32 6, %v714_v3  ;;  %v106_v38 = vrot.slane %v52_v10, %v105_v25  ;;  %v212_v51 = vunpack.c.0.s8 %v211_v50  ;;  %v276_v63 = vunpack.c.0.s8 %v275_v55 }
  0x3f   :  { %v134_v20 = vrot.slane %v118_v18, %v117_v9  ;;  %v126_v21 = vcombine.high %v118_v18, %v118_v18  ;;  %v127_v30 = vcombine.high %v125_v22, %v125_v22  ;;  %v141_v31 = vrot.slane %v125_v22, %v117_v9  ;;  %p618_p13 = por %p617_p12, %p616_p11 }
  0x40   :  { %v99_v39 = vrot.slane %v52_v10, %v98_v26  ;;  %v215_v57 = vsub.s32 %v212_v51, %v714_v3  ;;  %v279_v11 = vsub.s32 %v276_v63, %v714_v3  ;;  %vm374_vm2 = vcmask 130048  }
  0x41   :  { %v156_v27 = vcombine.high %v134_v20, %v134_v20  ;;  %v163_v28 = vrot.slane %v134_v20, %v718_v6  ;;  %v148_v29 = vrot.slane %v126_v21, %v117_v9  ;;  %v155_v35 = vrot.slane %v127_v30, %v117_v9  ;;  %v388_v20 = vld [vmem:[#allocation7 + $0x10] sm:$0xff]  ;;  %v389_v21 = vld [vmem:[#allocation7 + $0x18] sm:$0xff]  ;;  %p619_p0 = pnand %p618_p13, %p612_p10 }
  0x42   :  { %80 = vbcast.lane.b32.xlu1 %v78_v14, 256  ;;  %66 = vbcast.lane.b32.xlu0 %v64_v17, 256  ;;  %v179_v36 = vrot.slane %v141_v31, %v718_v6  ;;  %v157_v37 = vcombine.high %v141_v31, %v141_v31  ;;  %vm376_vm3 = vcmask 195584   ;;  %vm378_vm4 = vcmask 261120  }
  0x43   :  { %v171_v32 = vrot.slane %v156_v27, %v718_v6  ;;  %v158_v33 = vcombine.high %v148_v29, %v148_v29  ;;  %v167_v34 = vrot.slane %v148_v29, %v718_v6  ;;  %v183_v41 = vrot.slane %v155_v35, %v718_v6 }
  0x44   :  { %v159_v42 = vcombine.high %v155_v35, %v155_v35  ;;  %v187_v43 = vrot.slane %v157_v37, %v718_v6  ;;  %vm380_vm5 = vcmask 326656   ;;  %vm382_vm6 = vcmask 392192  }
  0x45   :  { %v175_v40 = vrot.slane %v158_v33, %v718_v6  ;;  %v391_v33 = vld [vmem:[#allocation7 + $0x28] sm:$0xff]  ;;  %vm384_vm7 = vcmask 457728   ;;  %vm394_vm8 = vcmask 523264  }
  0x46   :  { %94 = vbcast.lane.b32.xlu1 %v92_v23, 256  ;;  %87 = vbcast.lane.b32.xlu0 %v85_v24, 256  ;;  %v191_v44 = vrot.slane %v159_v42, %v718_v6 }
  0x4a   :  { %108 = vbcast.lane.b32.xlu1 %v106_v38, 256  ;;  %101 = vbcast.lane.b32.xlu0 %v99_v39, 256 }
  0xb0   :  { %v74_v52 = vpop.permute.xlu1 %73  ;;  %v60_v53 = vpop.permute.xlu0 %59 }
  0xb1   :  { %v202_v56 = vmul.f32 %v171_v32, %v74_v52  ;;  %v200_v58 = vmul.f32 %v163_v28, %v60_v53  ;;  %v518_v28 = vpack.c.bf16 %v389_v21, %v388_v20  ;;  %v390_v32 = vld [vmem:[#allocation7 + $0x20] sm:$0xff] }
  0xb2   :  { %v521_v38 = vpack.c.bf16 %v391_v33, %v390_v32 }
  0xb3   :  { %v208_v59 = vcombine.low %v200_v58, %v202_v56  ;;  %v209_v60 = vcombine.high %v200_v58, %v202_v56  ;;  %519 = vmatpush3.bf16.msra.mxu0 %v518_v28 }
  0xb4   :  { %v81_v61 = vpop.permute.xlu1 %80  ;;  %v67_v62 = vpop.permute.xlu0 %66  ;;  %520 = vmatprep.subr.bf16.mxu0 %v645_v47 }
  0xb5   :  { %v216_v0 = vrot.slane %v208_v59, %v215_v57  ;;  %v223_v1 = vrot.slane %v209_v60, %v215_v57  ;;  %v203_v2 = vmul.f32 %v175_v40, %v81_v61  ;;  %v201_v4 = vmul.f32 %v167_v34, %v67_v62 }
  0xb6   :  { %v650_v59 = vmov 0.0  }
  0xb7   :  { %v224_v5 = vcombine.low %v201_v4, %v203_v2  ;;  %v225_v6 = vcombine.high %v201_v4, %v203_v2  ;;  %522 = vmatpush3.bf16.msra.mxu0 %v521_v38  ;;  %511 = vmatprep.mubr.msk.f32.mxu0 %vm649_vm0, %v650_v59 }
  0xb8   :  { %v95_v7 = vpop.permute.xlu1 %94  ;;  %v88_v8 = vpop.permute.xlu0 %87  ;;  %523 = vmatprep.subr.bf16.mxu0 %v645_v47 }
  0xb9   :  { %v232_v9 = vrot.slane %v224_v5, %v215_v57  ;;  %v239_v10 = vrot.slane %v225_v6, %v215_v57  ;;  %v205_v16 = vmul.f32 %v183_v41, %v95_v7  ;;  %v204_v17 = vmul.f32 %v179_v36, %v88_v8 }
  0xbb   :  { %v273_v12 = vcombine.high %v216_v0, %v232_v9  ;;  %v288_v13 = vcombine.low %v223_v1, %v239_v10  ;;  %v289_v14 = vcombine.high %v223_v1, %v239_v10  ;;  %v272_v15 = vcombine.low %v216_v0, %v232_v9 }
  0xbc   :  { %v109_v18 = vpop.permute.xlu1 %108  ;;  %v102_v19 = vpop.permute.xlu0 %101 }
  0xbd   :  { %v207_v22 = vmul.f32 %v191_v44, %v109_v18  ;;  %v206_v23 = vmul.f32 %v187_v43, %v102_v19  ;;  %v287_v24 = vrot.slane %v273_v12, %v279_v11  ;;  %v280_v25 = vrot.slane %v272_v15, %v279_v11  ;;  %v392_v43 = vld [vmem:[#allocation7 + $0x30] sm:$0xff]  ;;  %v393_v44 = vld [vmem:[#allocation7 + $0x38] sm:$0xff] }
  0xbe   :  { %v296_v26 = vrot.slane %v288_v13, %v279_v11  ;;  %v303_v27 = vrot.slane %v289_v14, %v279_v11  ;;  %v524_v50 = vpack.c.bf16 %v393_v44, %v392_v43 }
  0xbf   :  { %v256_v29 = vcombine.low %v205_v16, %v207_v22  ;;  %v257_v30 = vcombine.high %v205_v16, %v207_v22  ;;  %v240_v3 = vcombine.low %v204_v17, %v206_v23  ;;  %v241_v31 = vcombine.high %v204_v17, %v206_v23 }
  0xc0   :  { %525 = vmatpush3.bf16.msra.mxu0 %v524_v50 }
  0xc1   :  { %v264_v34 = vrot.slane %v256_v29, %v215_v57  ;;  %v271_v35 = vrot.slane %v257_v30, %v215_v57  ;;  %v248_v36 = vrot.slane %v240_v3, %v215_v57  ;;  %v255_v37 = vrot.slane %v241_v31, %v215_v57 }
  0xc3   :  { %v305_v39 = vcombine.high %v248_v36, %v264_v34  ;;  %v320_v40 = vcombine.low %v255_v37, %v271_v35  ;;  %v321_v41 = vcombine.high %v255_v37, %v271_v35  ;;  %v304_v42 = vcombine.low %v248_v36, %v264_v34 }
  0xc5   :  { %v319_v45 = vrot.slane %v305_v39, %v279_v11  ;;  %v312_v46 = vrot.slane %v304_v42, %v279_v11  ;;  %v328_v48 = vrot.slane %v320_v40, %v279_v11  ;;  %v335_v49 = vrot.slane %v321_v41, %v279_v11 }
  0xc7   :  { %v338_v51 = vcombine.low %v287_v24, %v319_v45  ;;  %v337_v52 = vcombine.high %v280_v25, %v312_v46  ;;  %v336_v53 = vcombine.low %v280_v25, %v312_v46  ;;  %v340_v54 = vcombine.low %v296_v26, %v328_v48 }
  0xc8   :  { %v339_v55 = vcombine.high %v287_v24, %v319_v45  ;;  %v342_v56 = vcombine.low %v303_v27, %v335_v49  ;;  %v341_v57 = vcombine.high %v296_v26, %v328_v48  ;;  %v343_v58 = vcombine.high %v303_v27, %v335_v49 }
  0xc9   :  { %349 = vrot.lane.b32.xlu1 %v338_v51, %s648_s2  ;;  %345 = vrot.lane.b32.xlu0 %v337_v52, %s643_s15 }
  0xcd   :  { %357 = vrot.lane.b32.xlu1 %v340_v54, %s651_s21  ;;  %353 = vrot.lane.b32.xlu0 %v339_v55, %s652_s22 }
  0xd1   :  { %365 = vrot.lane.b32.xlu1 %v342_v56, %s653_s23  ;;  %361 = vrot.lane.b32.xlu0 %v341_v57, %s654_s24 }
  0xd5   :  { %369 = vrot.lane.b32.xlu0 %v343_v58, %s655_s25 }
 0x13b   :  { %v350_v47 = vpop.permute.xlu1 %349  ;;  %v346_v60 = vpop.permute.xlu0 %345 }
 0x13c   :  { %v373_v61 = vsel %vm372_vm1, %v336_v53, %v346_v60 }
 0x13d   :  { %v375_v0 = vsel %vm374_vm2, %v373_v61, %v350_v47 }
 0x13f   :  { %v358_v62 = vpop.permute.xlu1 %357  ;;  %v354_v63 = vpop.permute.xlu0 %353 }
 0x140   :  { %v377_v1 = vsel %vm376_vm3, %v375_v0, %v354_v63 }
 0x141   :  { %v379_v4 = vsel %vm378_vm4, %v377_v1, %v358_v62 }
 0x143   :  { %v362_v2 = vpop.permute.xlu0 %361  ;;  %v366_v5 = vpop.permute.xlu1 %365 }
 0x144   :  { %v381_v6 = vsel %vm380_vm5, %v379_v4, %v362_v2 }
 0x145   :  { %v383_v8 = vsel %vm382_vm6, %v381_v6, %v366_v5 }
 0x147   :  { %v370_v7 = vpop.permute.xlu0 %369 }
 0x148   :  { %v385_v9 = vsel %vm384_vm7, %v383_v8, %v370_v7 }
 0x149   :  { %512 = vmatmul.mubr.msk.f32.vlgmr.msra.gmra.mrb[0].mxu0 %vm394_vm8, %v385_v9 }
 0x21c   :  { %v464_v10 = vpop.f32.mrb[0].mxu0 }
 0x21d   :  { %468 = vst [vmem:[#allocation8] sm:$0xff] %v464_v10  ;;  %v513_v11 = vpop.f32.mrb[1].mxu0 }
 0x21e   :  { %622 = shalt.err (!%p619_p0)
}
 0x21f   :  { %s623_s4 = scalar_lea.hbm %s758_s3, 128 }
 0x220   :  { %p624_p1 = scmp.ne.s32.totalorder %s758_s3, %s623_s4  ;;  %p627_p2 = scmp.lt.u32.totalorder %s623_s4, %s758_s3 }
 0x222   :  { %p629_p3 = pnand %p627_p2, %p624_p1 }
 0x224   :  { %632 = shalt.err (!%p629_p3)
}
 0x225   :  { %478 = dma.vmem_to_hbm [thread:$0]  %s476_s27, 128, %s758_s3, [#allocation4]  }
 0x226   :  { %637 = dma.done.wait [#allocation4], 128  }
 0x227   :  { %638 = vsyncadd [#allocation4], 4294967168 }
 0x228   :  { %482 = vsyncpa [#allocation3], 1 }
 0x229   :  { %483 = vsyncpa [#allocation6], 1 }
 0x22a   :  { %484 = vsyncpa [#allocation4], 1 }

</bundles_post_ra>
